<compile_context>
chip_gen: v5e
topology: v5e:2x2
jax: 0.10.0
libtpu: 0.0.40
codegen_flags: <defaults>
</compile_context>

<pallas_src>
import jax
import jax.numpy as jnp
from jax.experimental import pallas as pl
from jax.experimental.pallas import tpu as pltpu


def _round_up(x, m):
    return ((x + m - 1) // m) * m


# ----------------------------------------------------------------------------
# Kernel
# ----------------------------------------------------------------------------
def qnetwork_kernel(s_ref, a_ref,
                    w1s_ref, w1a_ref, b1_ref,
                    w2_ref, b2_ref,
                    w3_ref, b3_ref,
                    w4_ref, b4_ref,
                    out_ref):
    # Weights define the MXU compute dtype (bf16 default / f32); accumulation
    # and all elementwise work (bias add, relu) stay f32.
    cdt = w1s_ref.dtype
    s = s_ref[...].astype(cdt)          # [TM, num_inputs]
    a = a_ref[...].astype(cdt)          # [TM, num_actions]

    # linear1 (split over state/action -> no concatenated activation needed)
    h = (jnp.dot(s, w1s_ref[...], preferred_element_type=jnp.float32)
         + jnp.dot(a, w1a_ref[...], preferred_element_type=jnp.float32)
         + b1_ref[...])
    h = jnp.maximum(h, 0.0)

    # linear2 + relu
    h = jnp.dot(h.astype(cdt), w2_ref[...],
                preferred_element_type=jnp.float32) + b2_ref[...]
    h = jnp.maximum(h, 0.0)

    # linear3 + relu
    h = jnp.dot(h.astype(cdt), w3_ref[...],
                preferred_element_type=jnp.float32) + b3_ref[...]
    h = jnp.maximum(h, 0.0)

    # linear4: lane-dense head.  w4 is stored as (8, H_pad) with the real
    # weights in row 0 (rows 1..7 zero).  Contracting the last dims gives
    # q8 = w4 @ h^T of shape [8, TM]; row 0 is the q row, already laid out
    # along lanes -> no transpose needed before the store.
    q8 = jax.lax.dot_general(
        w4_ref[...], h.astype(cdt),
        dimension_numbers=(((1,), (1,)), ((), ())),
        preferred_element_type=jnp.float32)
    q = q8[0:1, :] + b4_ref[0, 0]                 # [1, TM]  (b4 scalar in SMEM)
    out_ref[0] = q.astype(out_ref.dtype)          # block (1, 1, TM)


# ----------------------------------------------------------------------------
# Parameter prep (done once, outside the hot path)
# ----------------------------------------------------------------------------
def prepare_qnetwork_params(params, num_inputs, compute_dtype=jnp.bfloat16):
    """Split W1, transpose+pad W4, zero-pad hidden dim, cast to compute dtype.

    compute_dtype: jnp.bfloat16 (default, full-rate MXU on every generation)
    or jnp.float32 (bit-exact path). Biases stay f32 (f32 epilogue).
    Zero padding is mathematically exact (padded columns -> zero activations).
    """
    H = params["w2"].shape[0]
    # 256-lane alignment for real TD3 sizes (full-width v6e/v7x MXU pushes);
    # 128 for tiny hidden sizes (don't quadruple FLOPs).
    H_pad = _round_up(H, 256) if H >= 256 else _round_up(H, 128)

    def pad_cols(w):
        return jnp.pad(w, ((0, 0), (0, H_pad - w.shape[1])))

    def pad_rows_cols(w):
        return jnp.pad(w, ((0, H_pad - w.shape[0]), (0, H_pad - w.shape[1])))

    w1 = params["w1"]
    w4_rows = jnp.pad(params["w4"].T, ((0, 7), (0, H_pad - H)))   # (8, H_pad)
    return {
        "w1s": pad_cols(w1[:num_inputs]).astype(compute_dtype),
        "w1a": pad_cols(w1[num_inputs:]).astype(compute_dtype),
        "b1":  pad_cols(params["b1"]).astype(jnp.float32),
        "w2":  pad_rows_cols(params["w2"]).astype(compute_dtype),
        "b2":  pad_cols(params["b2"]).astype(jnp.float32),
        "w3":  pad_rows_cols(params["w3"]).astype(compute_dtype),
        "b3":  pad_cols(params["b3"]).astype(jnp.float32),
        "w4":  w4_rows.astype(compute_dtype),      # (8, H_pad), row 0 real
        "b4":  params["b4"].astype(jnp.float32),   # (1, 1) -> SMEM
    }


# ----------------------------------------------------------------------------
# Wrapper
# ----------------------------------------------------------------------------
def qnetwork_forward(state, action, kparams, *, batch_tile=1024,
                     core_parallel=False):
    """Pallas-backed forward of the TD3 QNetwork.

    state:   [B, num_inputs]  f32
    action:  [B, num_actions] f32
    kparams: output of prepare_qnetwork_params
    returns: [B, 1] f32
    core_parallel: set True on v7x to shard the batch grid across both TCs.
    """
    B, n_s = state.shape
    _, n_a = action.shape
    H_pad = kparams["w2"].shape[0]
    cdt_bytes = jnp.dtype(kparams["w2"].dtype).itemsize

    # Batch tile: clamp to B (cdiv handles the tail), then shrink until the
    # estimated working set fits comfortably under v7x's 64 MiB physical VMEM.
    TM = max(1, min(batch_tile, B))

    def vmem_estimate(tm):
        inputs = 2 * tm * (n_s + n_a) * 4                # double-buffered tiles
        outs = 2 * tm * 4
        param_bytes = 2 * ((n_s + n_a) * H_pad + 2 * H_pad * H_pad
                           + 8 * H_pad) * cdt_bytes      # weights (dbl-buffered)
        param_bytes += 2 * 3 * 8 * H_pad * 4             # f32 biases (8-row pad)
        acts = 4 * tm * H_pad * 4                        # live f32 intermediates
        return inputs + outs + param_bytes + acts

    while TM > 256 and vmem_estimate(TM) > 48 * 1024 * 1024:
        TM = max(256, TM // 2)

    est = vmem_estimate(TM)
    vmem_limit = int(min(max(2 * est, 32 * 1024 * 1024), 64 * 1024 * 1024))

    num_tiles = pl.cdiv(B, TM)

    def tile_map(i):        # batch-streamed operands
        return (i, 0)

    def pin_map(i):         # parameters: same block every step -> VMEM resident
        return (0, 0)

    in_specs = [
        pl.BlockSpec((TM, n_s), tile_map),
        pl.BlockSpec((TM, n_a), tile_map),
        pl.BlockSpec(kparams["w1s"].shape, pin_map),
        pl.BlockSpec(kparams["w1a"].shape, pin_map),
        pl.BlockSpec(kparams["b1"].shape, pin_map),
        pl.BlockSpec(kparams["w2"].shape, pin_map),
        pl.BlockSpec(kparams["b2"].shape, pin_map),
        pl.BlockSpec(kparams["w3"].shape, pin_map),
        pl.BlockSpec(kparams["b3"].shape, pin_map),
        pl.BlockSpec(kparams["w4"].shape, pin_map),
        pl.BlockSpec(memory_space=pltpu.MemorySpace.SMEM),   # b4 scalar
    ]
    # Lane-dense output: one [1, TM] row per grid step.
    out_spec = pl.BlockSpec((1, 1, TM), lambda i: (i, 0, 0))

    flops = 2 * B * ((n_s + n_a) * H_pad + 2 * H_pad * H_pad + H_pad)
    param_bytes_hbm = sum(int(v.size) * jnp.dtype(v.dtype).itemsize
                          for v in kparams.values())
    cost = pl.CostEstimate(
        flops=int(flops),
        transcendentals=0,
        bytes_accessed=int(B * (n_s + n_a + 1) * 4 + param_bytes_hbm))

    dim_sem = (pltpu.CORE_PARALLEL,) if core_parallel else ("parallel",)

    out = pl.pallas_call(
        qnetwork_kernel,
        out_shape=jax.ShapeDtypeStruct((num_tiles, 1, TM), jnp.float32),
        grid=(num_tiles,),
        in_specs=in_specs,
        out_specs=out_spec,
        compiler_params=pltpu.CompilerParams(
            dimension_semantics=dim_sem,
            vmem_limit_bytes=vmem_limit),
        cost_estimate=cost,
    )(state, action,
      kparams["w1s"], kparams["w1a"], kparams["b1"],
      kparams["w2"], kparams["b2"],
      kparams["w3"], kparams["b3"],
      kparams["w4"], kparams["b4"])

    # Padded tail lanes of the final tile contain garbage -> slice them off.
    return out.reshape(-1, 1)[:B]


# ----------------------------------------------------------------------------
# Init (mirrors the PyTorch module) + pure-JAX reference
# ----------------------------------------------------------------------------
def init_qnetwork_params(key, num_inputs, num_actions, hidden_size,
                         init_w=0.003):
    """Linear1-3: U(-1/sqrt(fan_in), 1/sqrt(fan_in)); Linear4: U(-init_w, init_w).

    Weights stored as [in, out] (transposed vs torch's [out, in])."""
    keys = jax.random.split(key, 8)
    d_in = num_inputs + num_actions

    def uni(k, shape, bound):
        return jax.random.uniform(k, shape, jnp.float32, -bound, bound)

    b1w = 1.0 / (d_in ** 0.5)
    b2w = 1.0 / (hidden_size ** 0.5)
    return {
        "w1": uni(keys[0], (d_in, hidden_size), b1w),
        "b1": uni(keys[1], (1, hidden_size), b1w),
        "w2": uni(keys[2], (hidden_size, hidden_size), b2w),
        "b2": uni(keys[3], (1, hidden_size), b2w),
        "w3": uni(keys[4], (hidden_size, hidden_size), b2w),
        "b3": uni(keys[5], (1, hidden_size), b2w),
        "w4": uni(keys[6], (hidden_size, 1), init_w),
        "b4": uni(keys[7], (1, 1), init_w),
    }


def qnetwork_reference(state, action, params):
    """Pure-JAX reference matching PyTorch forward semantics."""
    x = jnp.concatenate([state, action], axis=1)
    h = jax.nn.relu(x @ params["w1"] + params["b1"])
    h = jax.nn.relu(h @ params["w2"] + params["b2"])
    h = jax.nn.relu(h @ params["w3"] + params["b3"])
    return h @ params["w4"] + params["b4"]


# ----------------------------------------------------------------------------
# Self-test
# ----------------------------------------------------------------------------
if __name__ == "__main__":
    batch = 8
    num_inputs = 8
    num_actions = 4
    hidden_size = 32

    key = jax.random.PRNGKey(0)
    k_state, k_action, k_params, k_big = jax.random.split(key, 4)

    state = jax.random.normal(k_state, (batch, num_inputs), jnp.float32)
    action = jax.random.normal(k_action, (batch, num_actions), jnp.float32)
    params = init_qnetwork_params(k_params, num_inputs, num_actions,
                                  hidden_size, init_w=0.003)

    q_ref = qnetwork_reference(state, action, params)

    # f32 compute path: tight exactness check (single grid step).
    kparams_f32 = prepare_qnetwork_params(params, num_inputs,
                                          compute_dtype=jnp.float32)
    q = jax.block_until_ready(qnetwork_forward(state, action, kparams_f32))
    assert q.shape == (batch, 1)
    assert jnp.allclose(q, q_ref, atol=1e-4, rtol=1e-4), "mismatch vs reference"

    # bf16 (default) compute path: loose tolerance (expected quantization).
    kparams_bf16 = prepare_qnetwork_params(params, num_inputs)
    q_bf = jax.block_until_ready(qnetwork_forward(state, action, kparams_bf16))
    assert q_bf.shape == (batch, 1)
    assert jnp.allclose(q_bf, q_ref, atol=1e-2, rtol=5e-2), "bf16 path mismatch"

    # Larger batch: multi-step grid + partial final tile + lane-dense repack.
    B2 = 300
    ks, ka = jax.random.split(k_big)
    state2 = jax.random.normal(ks, (B2, num_inputs), jnp.float32)
    action2 = jax.random.normal(ka, (B2, num_actions), jnp.float32)
    q2_ref = qnetwork_reference(state2, action2, params)

    q2 = jax.block_until_ready(
        qnetwork_forward(state2, action2, kparams_f32, batch_tile=128))
    assert q2.shape == (B2, 1)
    assert jnp.allclose(q2, q2_ref, atol=1e-4, rtol=1e-4), "mismatch (tiled)"

    # Default large-tile bf16 path (TM = min(1024, 300) = 300, single step).
    q3 = jax.block_until_ready(qnetwork_forward(state2, action2, kparams_bf16))
    assert q3.shape == (B2, 1)
    assert jnp.allclose(q3, q2_ref, atol=1e-2, rtol=5e-2), "bf16 mismatch (big)"

    print("KERNEL_OK")
</pallas_src>

<mosaic_0001>
module attributes {stable_mosaic.version = 11 : i64} {
  func.func @qnetwork_kernel(%arg0: i32, %arg1: memref<8x8xf32, #tpu.memory_space<vmem>>, %arg2: memref<8x4xf32, #tpu.memory_space<vmem>>, %arg3: memref<8x128xf32, #tpu.memory_space<vmem>>, %arg4: memref<4x128xf32, #tpu.memory_space<vmem>>, %arg5: memref<1x128xf32, #tpu.memory_space<vmem>>, %arg6: memref<128x128xf32, #tpu.memory_space<vmem>>, %arg7: memref<1x128xf32, #tpu.memory_space<vmem>>, %arg8: memref<128x128xf32, #tpu.memory_space<vmem>>, %arg9: memref<1x128xf32, #tpu.memory_space<vmem>>, %arg10: memref<8x128xf32, #tpu.memory_space<vmem>>, %arg11: memref<1x1xf32, #tpu.memory_space<smem>>, %arg12: memref<1x1x8xf32, #tpu.memory_space<vmem>>) attributes {dimension_semantics = [#tpu.dimension_semantics<parallel>], iteration_bounds = array<i64: 1>, scalar_prefetch = 0 : i64, scratch_operands = 0 : i64, tpu.core_type = #tpu.core_type<tc>, window_params = [{transform_indices = @transform_0, window_bounds = array<i64: 8, 8>}, {transform_indices = @transform_1, window_bounds = array<i64: 8, 4>}, {pipeline_mode = #tpu.pipeline_mode<synchronous>, transform_indices = @transform_2, window_bounds = array<i64: 8, 128>}, {pipeline_mode = #tpu.pipeline_mode<synchronous>, transform_indices = @transform_3, window_bounds = array<i64: 4, 128>}, {pipeline_mode = #tpu.pipeline_mode<synchronous>, transform_indices = @transform_4, window_bounds = array<i64: 1, 128>}, {pipeline_mode = #tpu.pipeline_mode<synchronous>, transform_indices = @transform_5, window_bounds = array<i64: 128, 128>}, {pipeline_mode = #tpu.pipeline_mode<synchronous>, transform_indices = @transform_6, window_bounds = array<i64: 1, 128>}, {pipeline_mode = #tpu.pipeline_mode<synchronous>, transform_indices = @transform_7, window_bounds = array<i64: 128, 128>}, {pipeline_mode = #tpu.pipeline_mode<synchronous>, transform_indices = @transform_8, window_bounds = array<i64: 1, 128>}, {pipeline_mode = #tpu.pipeline_mode<synchronous>, transform_indices = @transform_9, window_bounds = array<i64: 8, 128>}, {transform_indices = @transform_10, window_bounds = array<i64: 1, 1>}, {transform_indices = @transform_11, window_bounds = array<i64: 1, 1, 8>}]} {
    %c0 = arith.constant 0 : index
    %c0_0 = arith.constant 0 : index
    %0 = vector.load %arg1[%c0, %c0_0] : memref<8x8xf32, #tpu.memory_space<vmem>>, vector<8x8xf32>
    %c0_1 = arith.constant 0 : index
    %c0_2 = arith.constant 0 : index
    %1 = vector.load %arg2[%c0_1, %c0_2] : memref<8x4xf32, #tpu.memory_space<vmem>>, vector<8x4xf32>
    %c0_3 = arith.constant 0 : index
    %c0_4 = arith.constant 0 : index
    %2 = vector.load %arg3[%c0_3, %c0_4] : memref<8x128xf32, #tpu.memory_space<vmem>>, vector<8x128xf32>
    %cst = arith.constant dense<0.000000e+00> : vector<8x128xf32>
    %3 = tpu.matmul %0, %2, %cst {dimension_numbers = #tpu.dot_dimension_numbers<[1], [0], [0], [1], [0, 0, 1, 1], [], []>} : vector<8x8xf32>, vector<8x128xf32>, vector<8x128xf32> -> vector<8x128xf32>
    %c0_5 = arith.constant 0 : index
    %c0_6 = arith.constant 0 : index
    %4 = vector.load %arg4[%c0_5, %c0_6] : memref<4x128xf32, #tpu.memory_space<vmem>>, vector<4x128xf32>
    %cst_7 = arith.constant dense<0.000000e+00> : vector<8x128xf32>
    %5 = tpu.matmul %1, %4, %cst_7 {dimension_numbers = #tpu.dot_dimension_numbers<[1], [0], [0], [1], [0, 0, 1, 1], [], []>} : vector<8x4xf32>, vector<4x128xf32>, vector<8x128xf32> -> vector<8x128xf32>
    %6 = arith.addf %3, %5 : vector<8x128xf32>
    %c0_8 = arith.constant 0 : index
    %c0_9 = arith.constant 0 : index
    %7 = vector.load %arg5[%c0_8, %c0_9] : memref<1x128xf32, #tpu.memory_space<vmem>>, vector<1x128xf32>
    %8 = vector.broadcast %7 : vector<1x128xf32> to vector<8x128xf32>
    %9 = arith.addf %6, %8 : vector<8x128xf32>
    %cst_10 = arith.constant 0.000000e+00 : f32
    %10 = vector.broadcast %cst_10 : f32 to vector<8x128xf32>
    %11 = arith.maximumf %9, %10 : vector<8x128xf32>
    %c0_11 = arith.constant 0 : index
    %c0_12 = arith.constant 0 : index
    %12 = vector.load %arg6[%c0_11, %c0_12] : memref<128x128xf32, #tpu.memory_space<vmem>>, vector<128x128xf32>
    %cst_13 = arith.constant dense<0.000000e+00> : vector<8x128xf32>
    %13 = tpu.matmul %11, %12, %cst_13 {dimension_numbers = #tpu.dot_dimension_numbers<[1], [0], [0], [1], [0, 0, 1, 1], [], []>} : vector<8x128xf32>, vector<128x128xf32>, vector<8x128xf32> -> vector<8x128xf32>
    %c0_14 = arith.constant 0 : index
    %c0_15 = arith.constant 0 : index
    %14 = vector.load %arg7[%c0_14, %c0_15] : memref<1x128xf32, #tpu.memory_space<vmem>>, vector<1x128xf32>
    %15 = vector.broadcast %14 : vector<1x128xf32> to vector<8x128xf32>
    %16 = arith.addf %13, %15 : vector<8x128xf32>
    %cst_16 = arith.constant 0.000000e+00 : f32
    %17 = vector.broadcast %cst_16 : f32 to vector<8x128xf32>
    %18 = arith.maximumf %16, %17 : vector<8x128xf32>
    %c0_17 = arith.constant 0 : index
    %c0_18 = arith.constant 0 : index
    %19 = vector.load %arg8[%c0_17, %c0_18] : memref<128x128xf32, #tpu.memory_space<vmem>>, vector<128x128xf32>
    %cst_19 = arith.constant dense<0.000000e+00> : vector<8x128xf32>
    %20 = tpu.matmul %18, %19, %cst_19 {dimension_numbers = #tpu.dot_dimension_numbers<[1], [0], [0], [1], [0, 0, 1, 1], [], []>} : vector<8x128xf32>, vector<128x128xf32>, vector<8x128xf32> -> vector<8x128xf32>
    %c0_20 = arith.constant 0 : index
    %c0_21 = arith.constant 0 : index
    %21 = vector.load %arg9[%c0_20, %c0_21] : memref<1x128xf32, #tpu.memory_space<vmem>>, vector<1x128xf32>
    %22 = vector.broadcast %21 : vector<1x128xf32> to vector<8x128xf32>
    %23 = arith.addf %20, %22 : vector<8x128xf32>
    %cst_22 = arith.constant 0.000000e+00 : f32
    %24 = vector.broadcast %cst_22 : f32 to vector<8x128xf32>
    %25 = arith.maximumf %23, %24 : vector<8x128xf32>
    %c0_23 = arith.constant 0 : index
    %c0_24 = arith.constant 0 : index
    %26 = vector.load %arg10[%c0_23, %c0_24] : memref<8x128xf32, #tpu.memory_space<vmem>>, vector<8x128xf32>
    %cst_25 = arith.constant dense<0.000000e+00> : vector<8x8xf32>
    %27 = tpu.matmul %26, %25, %cst_25 {dimension_numbers = #tpu.dot_dimension_numbers<[1], [1], [0], [0], [0, 0, 1, 0], [], []>} : vector<8x128xf32>, vector<8x128xf32>, vector<8x8xf32> -> vector<8x8xf32>
    %28 = vector.extract_strided_slice %27 {offsets = [0, 0], sizes = [1, 8], strides = [1, 1]} : vector<8x8xf32> to vector<1x8xf32>
    %c0_26 = arith.constant 0 : index
    %c0_27 = arith.constant 0 : index
    %29 = memref.load %arg11[%c0_26, %c0_27] : memref<1x1xf32, #tpu.memory_space<smem>>
    %30 = vector.broadcast %29 : f32 to vector<1x8xf32>
    %31 = arith.addf %28, %30 : vector<1x8xf32>
    %c0_28 = arith.constant 0 : index
    %c0_29 = arith.constant 0 : index
    %c0_30 = arith.constant 0 : index
    %32 = vector.load %arg12[%c0_28, %c0_29, %c0_30] : memref<1x1x8xf32, #tpu.memory_space<vmem>>, vector<1x1x8xf32>
    %33 = vector.shape_cast %32 : vector<1x1x8xf32> to vector<1x8xf32>
    %34 = vector.shape_cast %31 : vector<1x8xf32> to vector<1x1x8xf32>
    tpu.vector_store %arg12[%c0_28, %c0_29, %c0_30], %34 {strides = array<i32>} : memref<1x1x8xf32, #tpu.memory_space<vmem>>, vector<1x1x8xf32>,
    return
  }
  func.func @transform_0(%arg0: i32) -> (i32, i32) {
    %c0_i32 = arith.constant 0 : i32
    %c0_i32_0 = arith.constant 0 : i32
    return %arg0, %c0_i32 : i32, i32
  }
  func.func @transform_1(%arg0: i32) -> (i32, i32) {
    %c0_i32 = arith.constant 0 : i32
    %c0_i32_0 = arith.constant 0 : i32
    return %arg0, %c0_i32 : i32, i32
  }
  func.func @transform_2(%arg0: i32) -> (i32, i32) {
    %c0_i32 = arith.constant 0 : i32
    %c0_i32_0 = arith.constant 0 : i32
    %c0_i32_1 = arith.constant 0 : i32
    return %c0_i32, %c0_i32_0 : i32, i32
  }
  func.func @transform_3(%arg0: i32) -> (i32, i32) {
    %c0_i32 = arith.constant 0 : i32
    %c0_i32_0 = arith.constant 0 : i32
    %c0_i32_1 = arith.constant 0 : i32
    return %c0_i32, %c0_i32_0 : i32, i32
  }
  func.func @transform_4(%arg0: i32) -> (i32, i32) {
    %c0_i32 = arith.constant 0 : i32
    %c0_i32_0 = arith.constant 0 : i32
    %c0_i32_1 = arith.constant 0 : i32
    return %c0_i32, %c0_i32_0 : i32, i32
  }
  func.func @transform_5(%arg0: i32) -> (i32, i32) {
    %c0_i32 = arith.constant 0 : i32
    %c0_i32_0 = arith.constant 0 : i32
    %c0_i32_1 = arith.constant 0 : i32
    return %c0_i32, %c0_i32_0 : i32, i32
  }
  func.func @transform_6(%arg0: i32) -> (i32, i32) {
    %c0_i32 = arith.constant 0 : i32
    %c0_i32_0 = arith.constant 0 : i32
    %c0_i32_1 = arith.constant 0 : i32
    return %c0_i32, %c0_i32_0 : i32, i32
  }
  func.func @transform_7(%arg0: i32) -> (i32, i32) {
    %c0_i32 = arith.constant 0 : i32
    %c0_i32_0 = arith.constant 0 : i32
    %c0_i32_1 = arith.constant 0 : i32
    return %c0_i32, %c0_i32_0 : i32, i32
  }
  func.func @transform_8(%arg0: i32) -> (i32, i32) {
    %c0_i32 = arith.constant 0 : i32
    %c0_i32_0 = arith.constant 0 : i32
    %c0_i32_1 = arith.constant 0 : i32
    return %c0_i32, %c0_i32_0 : i32, i32
  }
  func.func @transform_9(%arg0: i32) -> (i32, i32) {
    %c0_i32 = arith.constant 0 : i32
    %c0_i32_0 = arith.constant 0 : i32
    %c0_i32_1 = arith.constant 0 : i32
    return %c0_i32, %c0_i32_0 : i32, i32
  }
  func.func @transform_10(%arg0: i32) -> (i32, i32) {
    %c0_i32 = arith.constant 0 : i32
    %c0_i32_0 = arith.constant 0 : i32
    %c0_i32_1 = arith.constant 0 : i32
    return %c0_i32, %c0_i32_0 : i32, i32
  }
  func.func @transform_11(%arg0: i32) -> (i32, i32, i32) {
    %c0_i32 = arith.constant 0 : i32
    %c0_i32_0 = arith.constant 0 : i32
    %c0_i32_1 = arith.constant 0 : i32
    return %arg0, %c0_i32, %c0_i32_0 : i32, i32, i32
  }
}

</mosaic_0001>

<bundles_post_ra>
// kernel: tpu_custom_call.1
= control target key start
LH: loop header
LB: loop body
LE: loop exit
PB: predicated region body
PF: predicated region fallthrough
CT: control target
= control target key end

     0   :  { %17 = vsyncpa [#allocation4], 0  ;;  %s532_s0 = inlined_call_operand.vmem [shape: f32[8,8], index: 0, kind: input, shape index: {}]   ;;  %s533_s1 = inlined_call_operand.vmem [shape: f32[8,4], index: 1, kind: input, shape index: {}]   ;;  %s534_s2 = inlined_call_operand.hbm [shape: f32[8,128], index: 2, kind: input, shape index: {}]   ;;  %s535_s3 = inlined_call_operand.hbm [shape: f32[4,128], index: 3, kind: input, shape index: {}]   ;;  %s536_s4 = inlined_call_operand.vmem [shape: f32[1,128], index: 4, kind: input, shape index: {}]   ;;  %s537_s5 = inlined_call_operand.hbm [shape: f32[128,128], index: 5, kind: input, shape index: {}]   ;;  %s538_s6 = inlined_call_operand.vmem [shape: f32[1,128], index: 6, kind: input, shape index: {}]   ;;  %s539_s7 = inlined_call_operand.hbm [shape: f32[128,128], index: 7, kind: input, shape index: {}]   ;;  %s540_s8 = inlined_call_operand.vmem [shape: f32[1,128], index: 8, kind: input, shape index: {}]   ;;  %s541_s9 = inlined_call_operand.vmem [shape: f32[8,128], index: 9, kind: input, shape index: {}]   ;;  %s542_s10 = inlined_call_operand.<no memory space> [shape: f32[1,1], index: 10, kind: input, shape index: {}]   ;;  %s543_s11 = inlined_call_operand.hbm [shape: f32[1,1,8], index: 11, kind: output, shape index: {}]  }
   0x1   :  { %18 = vsyncpa [#allocation7], 0 }
   0x2   :  { %19 = vsyncpa [#allocation10], 0  ;;  %s41_s19 = sshll.u32 %s535_s3, 4  ;;  %s42_s19 = int_to_ptr.hbm [resolvable:$true] %s41_s19 }
   0x3   :  { %20 = vsyncpa [#allocation5], 0  ;;  %s429_s20 = smov [#allocation6]   ;;  %s30_s24 = sshll.u32 %s534_s2, 4  ;;  %s31_s24 = int_to_ptr.hbm [resolvable:$true] %s30_s24 }
   0x4   :  { %s43_s21 = sshll.u32 %s429_s20, 4  ;;  %s430_s25 = smov [#allocation3]   ;;  %s44_s21 = int_to_ptr.vmem [resolvable:$true] %s43_s21 }
   0x5   :  { %46 = dma.hbm_to_vmem [thread:$0]  %s42_s19, 64, %s44_s21, [#allocation7]  }
   0x6   :  { %s32_s26 = sshll.u32 %s430_s25, 4  ;;  %s53_s29 = sshll.u32 %s537_s5, 4  ;;  %s33_s26 = int_to_ptr.vmem [resolvable:$true] %s32_s26  ;;  %s54_s29 = int_to_ptr.hbm [resolvable:$true] %s53_s29 }
   0x7   :  { %35 = dma.hbm_to_vmem [thread:$0]  %s31_s24, 128, %s33_s26, [#allocation4]  }
   0x8   :  { %s431_s3 = smov [#allocation8]   ;;  %s68_s14 = sshll.u32 %s539_s7, 4  ;;  %s69_s14 = int_to_ptr.hbm [resolvable:$true] %s68_s14 }
   0x9   :  { %s55_s30 = sshll.u32 %s431_s3, 4  ;;  %s432_s15 = smov 128   ;;  %s56_s30 = int_to_ptr.vmem [resolvable:$true] %s55_s30 }
   0xa   :  { %s433_s2 = smov 8   ;;  %s434_s16 = smov [#allocation9]  }
   0xb   :  { %61 = dma.hbm_to_vmem [thread:$0]  %s54_s29, 2048, %s56_s30, [#allocation7], %s432_s15, %s432_s15, %s433_s2  }
   0xc   :  { %s70_s17 = sshll.u32 %s434_s16, 4  ;;  %s71_s17 = int_to_ptr.vmem [resolvable:$true] %s70_s17 }
   0xd   :  { %76 = dma.hbm_to_vmem [thread:$0]  %s69_s14, 2048, %s71_s17, [#allocation10], %s432_s15, %s432_s15, %s433_s2  }
   0xe   :  { %421 = dma.done.wait [#allocation4], 128  }
   0xf   :  { %422 = vsyncadd [#allocation4], 4294967168 }
  0x10   :  { %423 = dma.done.wait [#allocation7], 2112  }
  0x11   :  { %424 = vsyncadd [#allocation7], 4294965184 }
  0x12   :  { %425 = dma.done.wait [#allocation10], 2048  }
  0x13   :  { %426 = vsyncadd [#allocation10], 4294965248  ;;  %vm107_vm0 = vcmask 1043456   ;;  %vm103_vm1 = vcmask 31744   ;;  %vm131_vm2 = vcmask 64512   ;;  %v101_v1 = vld [vmem:[#allocation3] sm:$0xff]  ;;  %v265_v51 = vstv %s542_s10 }
  0x14   :  { %v102_v0 = vld [vmem:[#allocation6] sm:$0xf]  ;;  %v100_v2 = vld [vmem:[%s533_s1] sm:$0xff]  ;;  %150 = vmatpush.msra.mxu1 %v101_v1  ;;  %v174_v6 = vld [vmem:[#allocation8 + $0x68] sm:$0xff]  ;;  %s276_s3 = sshll.u32 %s543_s11, 4  ;;  %vm267_vm3 = vcmask 57344   ;;  %s277_s3 = int_to_ptr.hbm [resolvable:$true] %s276_s3 }
  0x15   :  { %288 = vmatpush.msk.msra.mxu0 %vm107_vm0, %v102_v0  ;;  %v99_v3 = vld [vmem:[%s532_s0] sm:$0xff]  ;;  %v173_v7 = vld [vmem:[#allocation8 + $0x60] sm:$0xff]  ;;  %v170_v10 = vld [vmem:[#allocation8 + $0x48] sm:$0xff] }
  0x16   :  { %v176_v4 = vld [vmem:[#allocation8 + $0x78] sm:$0xff]  ;;  %289 = vmatmul.msk.f32.vlgmr.msra.gmra.mxu0 %vm103_vm1, %v100_v2  ;;  %290 = vmatmul.msk.f32.vlgmr.msra.gmra.mxu1 %vm131_vm2, %v99_v3  ;;  %v175_v5 = vld [vmem:[#allocation8 + $0x70] sm:$0xff]  ;;  %v169_v11 = vld [vmem:[#allocation8 + $0x40] sm:$0xff] }
  0x17   :  { %181 = vmatpush.msra.mxu2 %v176_v4  ;;  %v172_v8 = vld [vmem:[#allocation8 + $0x58] sm:$0xff]  ;;  %v171_v9 = vld [vmem:[#allocation8 + $0x50] sm:$0xff]  ;;  %v166_v14 = vld [vmem:[#allocation8 + $0x28] sm:$0xff] }
  0x18   :  { %v168_v12 = vld [vmem:[#allocation8 + $0x38] sm:$0xff]  ;;  %v167_v13 = vld [vmem:[#allocation8 + $0x30] sm:$0xff]  ;;  %v165_v15 = vld [vmem:[#allocation8 + $0x20] sm:$0xff] }
  0x19   :  { %182 = vmatpush.msra.mxu2 %v175_v5  ;;  %v164_v16 = vld [vmem:[#allocation8 + $0x18] sm:$0xff]  ;;  %v163_v17 = vld [vmem:[#allocation8 + $0x10] sm:$0xff]  ;;  %v162_v18 = vld [vmem:[#allocation8 + $0x8] sm:$0xff] }
  0x1a   :  { %v161_v19 = vld [vmem:[#allocation8] sm:$0xff]  ;;  %v217_v20 = vld [vmem:[#allocation9 + $0x78] sm:$0xff]  ;;  %v216_v21 = vld [vmem:[#allocation9 + $0x70] sm:$0xff] }
  0x1b   :  { %183 = vmatpush.msra.mxu2 %v174_v6  ;;  %222 = vmatpush.msra.mxu3 %v217_v20  ;;  %v215_v22 = vld [vmem:[#allocation9 + $0x68] sm:$0xff]  ;;  %v214_v23 = vld [vmem:[#allocation9 + $0x60] sm:$0xff]  ;;  %v213_v24 = vld [vmem:[#allocation9 + $0x58] sm:$0xff] }
  0x1c   :  { %v212_v25 = vld [vmem:[#allocation9 + $0x50] sm:$0xff]  ;;  %v211_v26 = vld [vmem:[#allocation9 + $0x48] sm:$0xff]  ;;  %v210_v27 = vld [vmem:[#allocation9 + $0x40] sm:$0xff] }
  0x1d   :  { %184 = vmatpush.msra.mxu2 %v173_v7  ;;  %223 = vmatpush.msra.mxu3 %v216_v21  ;;  %v209_v28 = vld [vmem:[#allocation9 + $0x38] sm:$0xff]  ;;  %v208_v29 = vld [vmem:[#allocation9 + $0x30] sm:$0xff]  ;;  %v207_v30 = vld [vmem:[#allocation9 + $0x28] sm:$0xff] }
  0x1e   :  { %v206_v31 = vld [vmem:[#allocation9 + $0x20] sm:$0xff]  ;;  %v205_v32 = vld [vmem:[#allocation9 + $0x18] sm:$0xff]  ;;  %v298_v33 = vld [vmem:[%s536_s4] ss:$0 sm:$0xff] }
  0x1f   :  { %185 = vmatpush.msra.mxu2 %v172_v8  ;;  %224 = vmatpush.msra.mxu3 %v215_v22  ;;  %v204_v39 = vld [vmem:[#allocation9 + $0x10] sm:$0xff]  ;;  %v203_v40 = vld [vmem:[#allocation9 + $0x8] sm:$0xff]  ;;  %v202_v41 = vld [vmem:[#allocation9] sm:$0xff] }
  0x20   :  { %v299_v42 = vld [vmem:[%s538_s6] ss:$0 sm:$0xff]  ;;  %s435_s6 = smov [#allocation11]  }
  0x21   :  { %186 = vmatpush.msra.mxu2 %v171_v9  ;;  %225 = vmatpush.msra.mxu3 %v214_v23  ;;  %v300_v46 = vld [vmem:[%s540_s8] ss:$0 sm:$0xff]  ;;  %s274_s27 = sshll.u32 %s435_s6, 4  ;;  %s275_s27 = int_to_ptr.vmem [resolvable:$true] %s274_s27 }
  0x22   :  { %v243_v50 = vld [vmem:[%s541_s9] sm:$0xff] }
  0x23   :  { %187 = vmatpush.msra.mxu2 %v170_v10  ;;  %226 = vmatpush.msra.mxu3 %v213_v24 }
  0x25   :  { %188 = vmatpush.msra.mxu2 %v169_v11  ;;  %227 = vmatpush.msra.mxu3 %v212_v25 }
  0x27   :  { %189 = vmatpush.msra.mxu2 %v168_v12  ;;  %228 = vmatpush.msra.mxu3 %v211_v26 }
  0x29   :  { %190 = vmatpush.msra.mxu2 %v167_v13  ;;  %229 = vmatpush.msra.mxu3 %v210_v27 }
  0x2b   :  { %191 = vmatpush.msra.mxu2 %v166_v14  ;;  %230 = vmatpush.msra.mxu3 %v209_v28 }
  0x2d   :  { %192 = vmatpush.msra.mxu2 %v165_v15  ;;  %231 = vmatpush.msra.mxu3 %v208_v29 }
  0x2f   :  { %193 = vmatpush.msra.mxu2 %v164_v16  ;;  %232 = vmatpush.msra.mxu3 %v207_v30 }
  0x31   :  { %194 = vmatpush.msra.mxu2 %v163_v17  ;;  %233 = vmatpush.msra.mxu3 %v206_v31 }
  0x33   :  { %195 = vmatpush.msra.mxu2 %v162_v18  ;;  %234 = vmatpush.msra.mxu3 %v205_v32 }
  0x35   :  { %196 = vmatpush.msra.mxu2 %v161_v19  ;;  %235 = vmatpush.msra.mxu3 %v204_v39 }
  0x37   :  { %236 = vmatpush.msra.mxu3 %v203_v40 }
  0x39   :  { %237 = vmatpush.msra.mxu3 %v202_v41 }
  0x93   :  { %v128_v34 = vpop.f32.mrf.mxu0  ;;  %v152_v35 = vpop.f32.mrf.mxu1 }
  0x94   :  { %v153_v36 = vadd.f32 %v152_v35, %v128_v34 }
  0x96   :  { %v159_v37 = vadd.f32 %v298_v33, %v153_v36 }
  0x98   :  { %v160_v38 = vmax.f32 %v159_v37, 0.0 }
  0x9a   :  { %197 = vmatmul.f32.vlgmr.msra.gmra.mxu2 %v160_v38 }
 0x11d   :  { %v198_v43 = vpop.f32.mrf.mxu2 }
 0x11e   :  { %v199_v44 = vadd.f32 %v299_v42, %v198_v43 }
 0x120   :  { %v201_v45 = vmax.f32 %v199_v44, 0.0 }
 0x122   :  { %238 = vmatmul.f32.vlgmr.msra.gmra.mxu3 %v201_v45 }
 0x1a5   :  { %v239_v47 = vpop.f32.mrf.mxu3 }
 0x1a6   :  { %v240_v48 = vadd.f32 %v300_v46, %v239_v47 }
 0x1a8   :  { %v242_v49 = vmax.f32 %v240_v48, 0.0 }
 0x1aa   :  { %259 = vmatpush.xpose.msrb.mxu0 %v242_v49 }
 0x1ad   :  { %260 = vmatmul.f32.vlgmr.msrb.gmra.mxu0 %v243_v50 }
 0x22a   :  { %v261_v52 = vpop.f32.mrf.mxu0 }
 0x22b   :  { %v266_v53 = vadd.f32 %v265_v51, %v261_v52 }
 0x22d   :  { %268 = vst.msk [vmem:[#allocation11] sm:$0x1] %vm267_vm3, %v266_v53 }
 0x22e   :  { %279 = dma.vmem_to_hbm [thread:$0]  %s275_s27, 16, %s277_s3, [#allocation5]  }
 0x22f   :  { %427 = dma.done.wait [#allocation5], 16  }
 0x230   :  { %428 = vsyncadd [#allocation5], 4294967280 }
 0x231   :  { %284 = vsyncpa [#allocation4], 1 }
 0x232   :  { %285 = vsyncpa [#allocation7], 1 }
 0x233   :  { %286 = vsyncpa [#allocation10], 1 }
 0x234   :  { %287 = vsyncpa [#allocation5], 1 }

</bundles_post_ra>
